<compile_context>
chip_gen: v7x
topology: tpu7x:2x2x1
jax: 0.10.0
libtpu: 0.0.40
codegen_flags: <defaults>
</compile_context>

<pallas_src>
import jax
import jax.numpy as jnp
from jax.experimental import pallas as pl
from jax.experimental.pallas import tpu as pltpu


def _round_up(x: int, m: int) -> int:
    return (x + m - 1) // m * m


def _patch_embed_kernel(p_ref, w_ref, b_ref, o_ref):
    # p_ref: (tm, PV)   flattened patch rows for this tile
    # w_ref: (PV, D)    projection weight, (in, out) layout, VMEM-resident
    # b_ref: (1, D)     projection bias (f32), VMEM-resident
    # o_ref: (tm, D)    lane-dense output tile (D = full embed dim)
    acc = jnp.dot(p_ref[...], w_ref[...], preferred_element_type=jnp.float32)
    o_ref[...] = (acc + b_ref[...]).astype(o_ref.dtype)


def _module_geometry(img_size, patch_size):
    """Same grid-size / left-over arithmetic as the PyTorch module."""
    grid0 = tuple(s // p for s, p in zip(img_size, patch_size))
    left_over = tuple(((g + 1) * p - s) % p
                      for p, s, g in zip(patch_size, img_size, grid0))
    grid_size = tuple((s + l) // p
                      for p, l, s in zip(patch_size, left_over, img_size))
    return left_over, grid_size


def patch_embed(x, w_conv, b, *, img_size, patch_size, block_m=512):
    """x: (B, Z, PHI, R); w_conv: (D, 1, pz, pp, pr) (nn.Conv3d layout); b: (D,)."""
    B, Z, PHI, R = x.shape
    assert (Z, PHI, R) == tuple(img_size)
    pz, pp, pr = patch_size
    D = w_conv.shape[0]
    PV = pz * pp * pr

    left_over, grid_size = _module_geometry(img_size, patch_size)
    Gz, Gp, Gr = grid_size
    num_patches = Gz * Gp * Gr

    # --- layout plumbing (wrapper-side): pad + patchify --------------------
    xp = jnp.pad(x, ((0, 0),
                     (0, left_over[0]),
                     (0, left_over[1]),
                     (0, left_over[2])))
    patches = xp.reshape(B, Gz, pz, Gp, pp, Gr, pr)
    patches = patches.transpose(0, 1, 3, 5, 2, 4, 6)   # (B, Gz, Gp, Gr, pz, pp, pr)
    patches = patches.reshape(B * num_patches, PV)     # (M, PV), conv-kernel order

    # Pad rows so the grid tiles evenly; padded rows just produce `bias`
    # and are cropped off below.
    M = B * num_patches
    tm = min(block_m, _round_up(M, 8))
    M_pad = _round_up(M, tm)
    if M_pad != M:
        patches = jnp.pad(patches, ((0, M_pad - M), (0, 0)))

    w2d = w_conv.reshape(D, PV).T                      # (PV, D), (in, out) layout
    b2d = b.reshape(1, D).astype(jnp.float32)          # f32 bias, added post-accumulate

    out = pl.pallas_call(
        _patch_embed_kernel,
        out_shape=jax.ShapeDtypeStruct((M_pad, D), x.dtype),
        grid=(M_pad // tm,),
        in_specs=[
            pl.BlockSpec((tm, PV), lambda i: (i, 0)),  # patch rows, per tile
            pl.BlockSpec((PV, D), lambda i: (0, 0)),   # weight, resident in VMEM
            pl.BlockSpec((1, D), lambda i: (0, 0)),    # bias, resident in VMEM
        ],
        out_specs=pl.BlockSpec((tm, D), lambda i: (i, 0)),
        compiler_params=pltpu.CompilerParams(
            dimension_semantics=("parallel",)),
    )(patches, w2d, b2d)

    return out[:M].reshape(B, num_patches, D)


def patch_embed_reference(x, w_conv, b, *, img_size, patch_size):
    """Plain-JAX reference mirroring the PyTorch forward (pad -> Conv3d -> flatten)."""
    left_over, _ = _module_geometry(img_size, patch_size)
    xp = jnp.pad(x[:, None], ((0, 0), (0, 0),
                              (0, left_over[0]),
                              (0, left_over[1]),
                              (0, left_over[2])))
    out = jax.lax.conv_general_dilated(
        xp, w_conv, window_strides=tuple(patch_size), padding="VALID",
        dimension_numbers=("NCDHW", "OIDHW", "NCDHW"),
        precision=jax.lax.Precision.HIGHEST,
        preferred_element_type=jnp.float32)
    out = out + b.reshape(1, -1, 1, 1, 1)
    B, D = out.shape[0], out.shape[1]
    return out.reshape(B, D, -1).transpose(0, 2, 1).astype(x.dtype)


if __name__ == "__main__":
    # Module defaults for geometry; small-but-lane-aligned embed_dim
    # (module default is 1024; 128 keeps the test tiny and still a multiple of 128).
    img_size = [45, 16, 9]
    patch_size = [2, 2, 2]
    embed_dim = 128
    B = 2

    key = jax.random.PRNGKey(0)
    kx, kw, kb = jax.random.split(key, 3)
    x = jax.random.normal(kx, (B, *img_size), dtype=jnp.float32)
    w_conv = jax.random.normal(kw, (embed_dim, 1, *patch_size), dtype=jnp.float32) * 0.1
    b = jax.random.normal(kb, (embed_dim,), dtype=jnp.float32) * 0.1

    y = patch_embed(x, w_conv, b, img_size=img_size, patch_size=patch_size)
    y = jax.block_until_ready(y)

    y_ref = patch_embed_reference(x, w_conv, b, img_size=img_size, patch_size=patch_size)

    _, grid_size = _module_geometry(img_size, patch_size)
    num_patches = grid_size[0] * grid_size[1] * grid_size[2]   # 23 * 8 * 5 = 920
    assert y.shape == (B, num_patches, embed_dim), y.shape
    assert jnp.allclose(y, y_ref, atol=5e-3, rtol=5e-3), "mismatch vs reference"

    print("KERNEL_OK")
</pallas_src>

<mosaic_0001>
module attributes {stable_mosaic.version = 11 : i64} {
  func.func @_patch_embed_kernel(%arg0: i32, %arg1: memref<512x8xf32, #tpu.memory_space<vmem>>, %arg2: memref<8x128xf32, #tpu.memory_space<vmem>>, %arg3: memref<1x128xf32, #tpu.memory_space<vmem>>, %arg4: memref<512x128xf32, #tpu.memory_space<vmem>>) attributes {dimension_semantics = [#tpu.dimension_semantics<parallel>], iteration_bounds = array<i64: 4>, scalar_prefetch = 0 : i64, scratch_operands = 0 : i64, tpu.core_type = #tpu.core_type<tc>, window_params = [{transform_indices = @transform_0, window_bounds = array<i64: 512, 8>}, {pipeline_mode = #tpu.pipeline_mode<synchronous>, transform_indices = @transform_1, window_bounds = array<i64: 8, 128>}, {pipeline_mode = #tpu.pipeline_mode<synchronous>, transform_indices = @transform_2, window_bounds = array<i64: 1, 128>}, {transform_indices = @transform_3, window_bounds = array<i64: 512, 128>}]} {
    %c0 = arith.constant 0 : index
    %c0_0 = arith.constant 0 : index
    %0 = vector.load %arg1[%c0, %c0_0] : memref<512x8xf32, #tpu.memory_space<vmem>>, vector<512x8xf32>
    %c0_1 = arith.constant 0 : index
    %c0_2 = arith.constant 0 : index
    %1 = vector.load %arg2[%c0_1, %c0_2] : memref<8x128xf32, #tpu.memory_space<vmem>>, vector<8x128xf32>
    %cst = arith.constant dense<0.000000e+00> : vector<512x128xf32>
    %2 = tpu.matmul %0, %1, %cst {dimension_numbers = #tpu.dot_dimension_numbers<[1], [0], [0], [1], [0, 0, 1, 1], [], []>} : vector<512x8xf32>, vector<8x128xf32>, vector<512x128xf32> -> vector<512x128xf32>
    %c0_3 = arith.constant 0 : index
    %c0_4 = arith.constant 0 : index
    %3 = vector.load %arg3[%c0_3, %c0_4] : memref<1x128xf32, #tpu.memory_space<vmem>>, vector<1x128xf32>
    %4 = vector.broadcast %3 : vector<1x128xf32> to vector<512x128xf32>
    %5 = arith.addf %2, %4 : vector<512x128xf32>
    %c0_5 = arith.constant 0 : index
    %c0_6 = arith.constant 0 : index
    %6 = vector.load %arg4[%c0_5, %c0_6] : memref<512x128xf32, #tpu.memory_space<vmem>>, vector<512x128xf32>
    tpu.vector_store %arg4[%c0_5, %c0_6], %5 {strides = array<i32>} : memref<512x128xf32, #tpu.memory_space<vmem>>, vector<512x128xf32>,
    return
  }
  func.func @transform_0(%arg0: i32) -> (i32, i32) {
    %c0_i32 = arith.constant 0 : i32
    %c0_i32_0 = arith.constant 0 : i32
    return %arg0, %c0_i32 : i32, i32
  }
  func.func @transform_1(%arg0: i32) -> (i32, i32) {
    %c0_i32 = arith.constant 0 : i32
    %c0_i32_0 = arith.constant 0 : i32
    %c0_i32_1 = arith.constant 0 : i32
    return %c0_i32, %c0_i32_0 : i32, i32
  }
  func.func @transform_2(%arg0: i32) -> (i32, i32) {
    %c0_i32 = arith.constant 0 : i32
    %c0_i32_0 = arith.constant 0 : i32
    %c0_i32_1 = arith.constant 0 : i32
    return %c0_i32, %c0_i32_0 : i32, i32
  }
  func.func @transform_3(%arg0: i32) -> (i32, i32) {
    %c0_i32 = arith.constant 0 : i32
    %c0_i32_0 = arith.constant 0 : i32
    return %arg0, %c0_i32 : i32, i32
  }
}

</mosaic_0001>

<bundles_post_ra>
// kernel: tpu_custom_call.1
= control target key start
LH: loop header
LB: loop body
LE: loop exit
PB: predicated region body
PF: predicated region fallthrough
CT: control target
= control target key end

     0   :  { %8 = vsyncpa [#allocation3], 0  ;;  %s1708_s0 = inlined_call_operand.vmem [shape: f32[2048,8], index: 0, kind: input, shape index: {}]   ;;  %s1709_s1 = inlined_call_operand.vmem [shape: f32[8,128], index: 1, kind: input, shape index: {}]   ;;  %s1710_s2 = inlined_call_operand.vmem [shape: f32[1,128], index: 2, kind: input, shape index: {}]   ;;  %s1711_s3 = inlined_call_operand.hbm [shape: f32[2048,128], index: 3, kind: output, shape index: {}]  }
   0x1   :  { %10 = vsyncpa [#allocation3 + $0x1], 0  ;;  %s1333_s12 = smov 0   ;;  %s1335_s13 = smov 0  }
   0x2   :  { %s1337_s14 = smov 0   ;;  %s1339_s15 = smov 0  }
   0x3 LB: > { %s1354_s16 = sadd.s32 4294967295, %s1308_s15   ;;  %s962_s17 = sadd.s32 4294967294, %s1308_s15   ;;  %s1308_s15 = sphi %s1339_s15, %s1717_s15   ;;  %s1304_s14 = sphi %s1337_s14, %s1716_s14   ;;  %s1300_s13 = sphi %s1335_s13, %s1715_s13   ;;  %s1296_s12 = sphi %s1333_s12, %s1714_s12  }
   0x4   : > { %s1358_s18 = sadd.s32 1, %s1308_s15   ;;  %s91_s19 = sadd.s32 1, %s1304_s14 }
   0x5   : > { %s88_s20 = ssub.s32 %s1308_s15, %s1358_s18  ;;  %p101_p0 = scmp.ne.s32.totalorder %s1304_s14, %s1300_s13 }
   0x6   : > { %p89_p1 = scmp.eq.s32.totalorder %s88_s20, 0  ;;  %p102_p2 = scmp.eq.s32.totalorder %s1354_s16, 3 }
   0x7   : > { %p107_p3 = scmp.ne.s32.totalorder %s1300_s13, %s1296_s12  ;;  %p108_p4 = scmp.eq.s32.totalorder %s962_s17, 3 }
   0x8   : > { %s1369_s21 = scalar_select %p89_p1, %s1304_s14, %s91_s19  }
   0x9   : > { %p1371_p5 = por %p102_p2, %p101_p0  ;;  %p1375_p6 = por %p108_p4, %p107_p3 }
   0xa   : > { %p965_p7 = scmp.ge.s32.totalorder %s1308_s15, 1  ;;  %p141_p8 = scmp.lt.s32.totalorder %s1308_s15, 5 }
   0xc   : > { %p142_p9 = pnand %p965_p7, %p141_p8 }
   0xd   : > { %v236_v0 = vld [vmem:[%s1709_s1] sm:$0xff] (!%p142_p9)  ;;  %s967_s26 = sshll.u32 (!%p142_p9), %s1354_s16, 6  ;;  %vm244_vm0 = vcmask (!%p142_p9), 64512   ;;  %s162_s4 = sand.u32 (!%p142_p9), 1, %s1300_s13  }
   0xe   : > { %145 = sbr.rel (%p142_p9) target bundleno = 317 (0x13d), region = 32  ;;  %1105 = vmatprep.subr.mxu0 (!%p142_p9), %v236_v0  ;;  %1203 = vmatprep.subr.mxu1 (!%p142_p9), %v236_v0  ;;  %p166_p10 = scmp.lt.s32.totalorder (!%p142_p9), %s967_s26, 255 }
   0xf   : > { %1106 = vmatpush3.msra.mxu0 (!%p142_p9), %v236_v0  ;;  %1204 = vmatpush3.msra.mxu1 (!%p142_p9), %v236_v0  ;;  %s966_s5 = sshll.u32 (!%p142_p9), %s162_s4, 9  ;;  %s1039_s9 = sshll.u32 (!%p142_p9), %s1354_s16, 13 }
  0x10   : > { %s1530_s8 = scalar_lea.vmem (!%p142_p9), [#allocation2], %s966_s5  ;;  %s1655_s17 = scalar_lea.hbm (!%p142_p9), %s1711_s3, %s1039_s9 }
  0x11   : > { %s900_s10 = sshll.u32 (!%p142_p9), %s1530_s8, 4  ;;  %s1667_s19 = scalar_lea.sflag (!%p142_p9), [#allocation3], %s162_s4  ;;  %s1657_s10 = int_to_ptr.vmem [resolvable:$true] %s900_s10 }
  0x12   : > { %s1246_s20 = scalar_lea.vmem (!%p142_p9), %s1657_s10, 8192  ;;  %s1310_s24 = smov (!%p142_p9), [#allocation2]  }
  0x13   : > { %p1247_p11 = scmp.ne.s32.totalorder (!%p142_p9), %s1657_s10, %s1246_s20  ;;  %s1250_s25 = sshll.u32 (!%p142_p9), %s1310_s24, 4  ;;  %s1251_s25 = int_to_ptr.vmem [resolvable:$false] %s1250_s25 }
  0x14   : > { %p1253_p0 = scmp.lt.s32.totalorder (!%p142_p9), %s1657_s10, %s1251_s25 }
  0x15   : > { %s1719_s26 = smov (!%p166_p10, %s967_s26), 255  ;;  %p1248_p12 = pnand %p1247_p11, %p1371_p5 }
  0x16   : > { %s968_s27 = sshll.u32 %s1719_s26, 3  ;;  %s1252_s26 = scalar_lea.vmem %s1251_s25, 16384 }
  0x17   : > { %s1388_s30 = scalar_lea.vmem %s1708_s0, %s968_s27  ;;  %p1249_p13 = pneg %p1248_p12 }
  0x18   : > { %v172_v1 = vld [vmem:[%s1388_s30] sm:$0xff]  ;;  %v173_v3 = vld [vmem:[%s1388_s30 + $0x8] sm:$0xff]  ;;  %v174_v5 = vld [vmem:[%s1388_s30 + $0x10] sm:$0xff]  ;;  %p1254_p1 = scmp.lt.s32.totalorder %s1252_s26, %s1246_s20 }
  0x19   : > { %v204_v2 = vld [vmem:[%s1388_s30 + $0x100] sm:$0xff]  ;;  %1107 = vmatprep.mubr.msk.f32.mxu0 %vm244_vm0, %v172_v1  ;;  %v205_v4 = vld [vmem:[%s1388_s30 + $0x108] sm:$0xff]  ;;  %v206_v6 = vld [vmem:[%s1388_s30 + $0x110] sm:$0xff] }
  0x1a   : > { %1155 = vmatprep.mubr.msk.f32.mxu1 %vm244_vm0, %v204_v2  ;;  %1108 = vmatmul.mubr.msk.f32.vlgmr.msra.gmra.mrb[0].mxu0 %vm244_vm0, %v173_v3  ;;  %v175_v7 = vld [vmem:[%s1388_s30 + $0x18] sm:$0xff]  ;;  %v176_v9 = vld [vmem:[%s1388_s30 + $0x20] sm:$0xff]  ;;  %v177_v11 = vld [vmem:[%s1388_s30 + $0x28] sm:$0xff]  ;;  %p1255_p2 = por %p1254_p1, %p1253_p0 }
  0x1b   : > { %1156 = vmatmul.mubr.msk.f32.vlgmr.msra.gmra.mrb[0].mxu1 %vm244_vm0, %v205_v4  ;;  %1110 = vmatprep.mubr.msk.f32.mxu0 %vm244_vm0, %v174_v5  ;;  %v207_v8 = vld [vmem:[%s1388_s30 + $0x118] sm:$0xff]  ;;  %v208_v10 = vld [vmem:[%s1388_s30 + $0x120] sm:$0xff]  ;;  %v209_v12 = vld [vmem:[%s1388_s30 + $0x128] sm:$0xff] }
  0x1c   : > { %1158 = vmatprep.mubr.msk.f32.mxu1 %vm244_vm0, %v206_v6  ;;  %v178_v13 = vld [vmem:[%s1388_s30 + $0x30] sm:$0xff]  ;;  %v179_v15 = vld [vmem:[%s1388_s30 + $0x38] sm:$0xff]  ;;  %v180_v17 = vld [vmem:[%s1388_s30 + $0x40] sm:$0xff]  ;;  %p1256_p3 = pnand %p1255_p2, %p1249_p13 }
  0x1d   : > { %v210_v14 = vld [vmem:[%s1388_s30 + $0x130] sm:$0xff]  ;;  %v211_v16 = vld [vmem:[%s1388_s30 + $0x138] sm:$0xff]  ;;  %v212_v18 = vld [vmem:[%s1388_s30 + $0x140] sm:$0xff] }
  0x1e   : > { %1111 = vmatmul.mubr.msk.f32.gmra.mrb[2].mxu0 %vm244_vm0, %v175_v7  ;;  %v181_v19 = vld [vmem:[%s1388_s30 + $0x48] sm:$0xff]  ;;  %v182_v21 = vld [vmem:[%s1388_s30 + $0x50] sm:$0xff]  ;;  %v183_v23 = vld [vmem:[%s1388_s30 + $0x58] sm:$0xff] }
  0x1f   : > { %1159 = vmatmul.mubr.msk.f32.gmra.mrb[2].mxu1 %vm244_vm0, %v207_v8  ;;  %1113 = vmatprep.mubr.msk.f32.mxu0 %vm244_vm0, %v176_v9  ;;  %v213_v20 = vld [vmem:[%s1388_s30 + $0x148] sm:$0xff]  ;;  %v214_v22 = vld [vmem:[%s1388_s30 + $0x150] sm:$0xff]  ;;  %v215_v24 = vld [vmem:[%s1388_s30 + $0x158] sm:$0xff] }
  0x20   : > { %1161 = vmatprep.mubr.msk.f32.mxu1 %vm244_vm0, %v208_v10  ;;  %v184_v25 = vld [vmem:[%s1388_s30 + $0x60] sm:$0xff]  ;;  %v185_v27 = vld [vmem:[%s1388_s30 + $0x68] sm:$0xff]  ;;  %v186_v29 = vld [vmem:[%s1388_s30 + $0x70] sm:$0xff] }
  0x21   : > { %v216_v26 = vld [vmem:[%s1388_s30 + $0x160] sm:$0xff]  ;;  %v217_v28 = vld [vmem:[%s1388_s30 + $0x168] sm:$0xff]  ;;  %v218_v30 = vld [vmem:[%s1388_s30 + $0x170] sm:$0xff] }
  0x22   : > { %1114 = vmatmul.mubr.msk.f32.gmra.mrb[4].mxu0 %vm244_vm0, %v177_v11  ;;  %v187_v31 = vld [vmem:[%s1388_s30 + $0x78] sm:$0xff]  ;;  %v188_v33 = vld [vmem:[%s1388_s30 + $0x80] sm:$0xff]  ;;  %v189_v35 = vld [vmem:[%s1388_s30 + $0x88] sm:$0xff] }
  0x23   : > { %1162 = vmatmul.mubr.msk.f32.gmra.mrb[4].mxu1 %vm244_vm0, %v209_v12  ;;  %1116 = vmatprep.mubr.msk.f32.mxu0 %vm244_vm0, %v178_v13  ;;  %v219_v32 = vld [vmem:[%s1388_s30 + $0x178] sm:$0xff]  ;;  %v220_v34 = vld [vmem:[%s1388_s30 + $0x180] sm:$0xff]  ;;  %v221_v36 = vld [vmem:[%s1388_s30 + $0x188] sm:$0xff] }
  0x24   : > { %1164 = vmatprep.mubr.msk.f32.mxu1 %vm244_vm0, %v210_v14  ;;  %v190_v37 = vld [vmem:[%s1388_s30 + $0x90] sm:$0xff]  ;;  %v191_v39 = vld [vmem:[%s1388_s30 + $0x98] sm:$0xff]  ;;  %v192_v41 = vld [vmem:[%s1388_s30 + $0xa0] sm:$0xff] }
  0x25   : > { %v222_v38 = vld [vmem:[%s1388_s30 + $0x190] sm:$0xff]  ;;  %v223_v40 = vld [vmem:[%s1388_s30 + $0x198] sm:$0xff]  ;;  %v224_v42 = vld [vmem:[%s1388_s30 + $0x1a0] sm:$0xff] }
  0x26   : > { %1117 = vmatmul.mubr.msk.f32.gmra.mrb[6].mxu0 %vm244_vm0, %v179_v15  ;;  %v193_v43 = vld [vmem:[%s1388_s30 + $0xa8] sm:$0xff]  ;;  %v194_v45 = vld [vmem:[%s1388_s30 + $0xb0] sm:$0xff]  ;;  %v195_v47 = vld [vmem:[%s1388_s30 + $0xb8] sm:$0xff] }
  0x27   : > { %1165 = vmatmul.mubr.msk.f32.gmra.mrb[6].mxu1 %vm244_vm0, %v211_v16  ;;  %1119 = vmatprep.mubr.msk.f32.mxu0 %vm244_vm0, %v180_v17  ;;  %v225_v44 = vld [vmem:[%s1388_s30 + $0x1a8] sm:$0xff]  ;;  %v226_v46 = vld [vmem:[%s1388_s30 + $0x1b0] sm:$0xff]  ;;  %v227_v48 = vld [vmem:[%s1388_s30 + $0x1b8] sm:$0xff] }
  0x28   : > { %1167 = vmatprep.mubr.msk.f32.mxu1 %vm244_vm0, %v212_v18  ;;  %v196_v49 = vld [vmem:[%s1388_s30 + $0xc0] sm:$0xff]  ;;  %v197_v51 = vld [vmem:[%s1388_s30 + $0xc8] sm:$0xff]  ;;  %v198_v53 = vld [vmem:[%s1388_s30 + $0xd0] sm:$0xff] }
  0x29   : > { %v228_v50 = vld [vmem:[%s1388_s30 + $0x1c0] sm:$0xff]  ;;  %v229_v52 = vld [vmem:[%s1388_s30 + $0x1c8] sm:$0xff]  ;;  %v230_v54 = vld [vmem:[%s1388_s30 + $0x1d0] sm:$0xff] }
  0x2a   : > { %1120 = vmatmul.mubr.msk.f32.gmra.mrb[8].mxu0 %vm244_vm0, %v181_v19  ;;  %v199_v55 = vld [vmem:[%s1388_s30 + $0xd8] sm:$0xff]  ;;  %v200_v57 = vld [vmem:[%s1388_s30 + $0xe0] sm:$0xff]  ;;  %v201_v59 = vld [vmem:[%s1388_s30 + $0xe8] sm:$0xff] }
  0x2b   : > { %1168 = vmatmul.mubr.msk.f32.gmra.mrb[8].mxu1 %vm244_vm0, %v213_v20  ;;  %1122 = vmatprep.mubr.msk.f32.mxu0 %vm244_vm0, %v182_v21  ;;  %v231_v56 = vld [vmem:[%s1388_s30 + $0x1d8] sm:$0xff]  ;;  %v232_v58 = vld [vmem:[%s1388_s30 + $0x1e0] sm:$0xff]  ;;  %v233_v60 = vld [vmem:[%s1388_s30 + $0x1e8] sm:$0xff] }
  0x2c   : > { %1170 = vmatprep.mubr.msk.f32.mxu1 %vm244_vm0, %v214_v22  ;;  %v202_v61 = vld [vmem:[%s1388_s30 + $0xf0] sm:$0xff]  ;;  %v203_v63 = vld [vmem:[%s1388_s30 + $0xf8] sm:$0xff]  ;;  %v1524_v1 = vld [vmem:[%s1710_s2] ss:$0 sm:$0xff] }
  0x2d   : > { %v234_v62 = vld [vmem:[%s1388_s30 + $0x1f0] sm:$0xff]  ;;  %v235_v0 = vld [vmem:[%s1388_s30 + $0x1f8] sm:$0xff] }
  0x2e   : > { %1123 = vmatmul.mubr.msk.f32.gmra.mrb[10].mxu0 %vm244_vm0, %v183_v23 }
  0x2f   : > { %1171 = vmatmul.mubr.msk.f32.gmra.mrb[10].mxu1 %vm244_vm0, %v215_v24  ;;  %1125 = vmatprep.mubr.msk.f32.mxu0 %vm244_vm0, %v184_v25 }
  0x30   : > { %1173 = vmatprep.mubr.msk.f32.mxu1 %vm244_vm0, %v216_v26 }
  0x32   : > { %1126 = vmatmul.mubr.msk.f32.gmra.mrb[12].mxu0 %vm244_vm0, %v185_v27 }
  0x33   : > { %1174 = vmatmul.mubr.msk.f32.gmra.mrb[12].mxu1 %vm244_vm0, %v217_v28  ;;  %1128 = vmatprep.mubr.msk.f32.mxu0 %vm244_vm0, %v186_v29 }
  0x34   : > { %1176 = vmatprep.mubr.msk.f32.mxu1 %vm244_vm0, %v218_v30 }
  0x36   : > { %1129 = vmatmul.mubr.msk.f32.gmra.mrb[14].mxu0 %vm244_vm0, %v187_v31 }
  0x37   : > { %1177 = vmatmul.mubr.msk.f32.gmra.mrb[14].mxu1 %vm244_vm0, %v219_v32  ;;  %1131 = vmatprep.mubr.msk.f32.mxu0 %vm244_vm0, %v188_v33 }
  0x38   : > { %1179 = vmatprep.mubr.msk.f32.mxu1 %vm244_vm0, %v220_v34 }
  0x3a   : > { %1132 = vmatmul.mubr.msk.f32.gmra.mrb[16].mxu0 %vm244_vm0, %v189_v35 }
  0x3b   : > { %1180 = vmatmul.mubr.msk.f32.gmra.mrb[16].mxu1 %vm244_vm0, %v221_v36  ;;  %1134 = vmatprep.mubr.msk.f32.mxu0 %vm244_vm0, %v190_v37 }
  0x3c   : > { %1182 = vmatprep.mubr.msk.f32.mxu1 %vm244_vm0, %v222_v38 }
  0x3e   : > { %1135 = vmatmul.mubr.msk.f32.gmra.mrb[18].mxu0 %vm244_vm0, %v191_v39 }
  0x3f   : > { %1183 = vmatmul.mubr.msk.f32.gmra.mrb[18].mxu1 %vm244_vm0, %v223_v40  ;;  %1137 = vmatprep.mubr.msk.f32.mxu0 %vm244_vm0, %v192_v41 }
  0x40   : > { %1185 = vmatprep.mubr.msk.f32.mxu1 %vm244_vm0, %v224_v42 }
  0x42   : > { %1138 = vmatmul.mubr.msk.f32.gmra.mrb[20].mxu0 %vm244_vm0, %v193_v43 }
  0x43   : > { %1186 = vmatmul.mubr.msk.f32.gmra.mrb[20].mxu1 %vm244_vm0, %v225_v44  ;;  %1140 = vmatprep.mubr.msk.f32.mxu0 %vm244_vm0, %v194_v45 }
  0x44   : > { %1188 = vmatprep.mubr.msk.f32.mxu1 %vm244_vm0, %v226_v46 }
  0x46   : > { %1141 = vmatmul.mubr.msk.f32.gmra.mrb[22].mxu0 %vm244_vm0, %v195_v47 }
  0x47   : > { %1189 = vmatmul.mubr.msk.f32.gmra.mrb[22].mxu1 %vm244_vm0, %v227_v48  ;;  %1143 = vmatprep.mubr.msk.f32.mxu0 %vm244_vm0, %v196_v49 }
  0x48   : > { %1191 = vmatprep.mubr.msk.f32.mxu1 %vm244_vm0, %v228_v50 }
  0x4a   : > { %1144 = vmatmul.mubr.msk.f32.gmra.mrb[24].mxu0 %vm244_vm0, %v197_v51 }
  0x4b   : > { %1192 = vmatmul.mubr.msk.f32.gmra.mrb[24].mxu1 %vm244_vm0, %v229_v52  ;;  %1146 = vmatprep.mubr.msk.f32.mxu0 %vm244_vm0, %v198_v53 }
  0x4c   : > { %1194 = vmatprep.mubr.msk.f32.mxu1 %vm244_vm0, %v230_v54 }
  0x4e   : > { %1147 = vmatmul.mubr.msk.f32.gmra.mrb[26].mxu0 %vm244_vm0, %v199_v55 }
  0x4f   : > { %1195 = vmatmul.mubr.msk.f32.gmra.mrb[26].mxu1 %vm244_vm0, %v231_v56  ;;  %1149 = vmatprep.mubr.msk.f32.mxu0 %vm244_vm0, %v200_v57 }
  0x50   : > { %1197 = vmatprep.mubr.msk.f32.mxu1 %vm244_vm0, %v232_v58 }
  0x52   : > { %1150 = vmatmul.mubr.msk.f32.gmra.mrb[28].mxu0 %vm244_vm0, %v201_v59 }
  0x53   : > { %1198 = vmatmul.mubr.msk.f32.gmra.mrb[28].mxu1 %vm244_vm0, %v233_v60  ;;  %1152 = vmatprep.mubr.msk.f32.mxu0 %vm244_vm0, %v202_v61 }
  0x54   : > { %1200 = vmatprep.mubr.msk.f32.mxu1 %vm244_vm0, %v234_v62 }
  0x56   : > { %1153 = vmatmul.mubr.msk.f32.gmra.mrb[30].mxu0 %vm244_vm0, %v203_v63 }
  0x57   : > { %1201 = vmatmul.mubr.msk.f32.gmra.mrb[30].mxu1 %vm244_vm0, %v235_v0 }
  0xed   : > { %v1109_v2 = vpop.f32.mrb[0].mxu0 }
  0xee   : > { %v1157_v3 = vpop.f32.mrb[0].mxu1  ;;  %v509_v4 = vadd.f32 %v1109_v2, %v1524_v1  ;;  %v503_v6 = vpop.f32.mrb[1].mxu0 }
  0xef   : > { %v669_v5 = vadd.f32 %v1157_v3, %v1524_v1  ;;  %v663_v7 = vpop.f32.mrb[1].mxu1  ;;  %v504_v8 = vadd.f32 %v1524_v1, %v503_v6 }
  0xf0   : > { %v664_v9 = vadd.f32 %v1524_v1, %v663_v7  ;;  %823 = vst [vmem:[%s1530_s8 + $0x8] sm:$0xff] %v509_v4 }
  0xf1   : > { %855 = vst [vmem:[%s1530_s8 + $0x108] sm:$0xff] %v669_v5  ;;  %822 = vst [vmem:[%s1530_s8] sm:$0xff] %v504_v8  ;;  %v1112_v10 = vpop.f32.mrb[2].mxu0 }
  0xf2   : > { %854 = vst [vmem:[%s1530_s8 + $0x100] sm:$0xff] %v664_v9  ;;  %v1160_v11 = vpop.f32.mrb[2].mxu1  ;;  %v519_v12 = vadd.f32 %v1112_v10, %v1524_v1  ;;  %v513_v14 = vpop.f32.mrb[3].mxu0 }
  0xf3   : > { %v679_v13 = vadd.f32 %v1160_v11, %v1524_v1  ;;  %v673_v15 = vpop.f32.mrb[3].mxu1  ;;  %v514_v16 = vadd.f32 %v1524_v1, %v513_v14 }
  0xf4   : > { %v674_v17 = vadd.f32 %v1524_v1, %v673_v15  ;;  %825 = vst [vmem:[%s1530_s8 + $0x18] sm:$0xff] %v519_v12 }
  0xf5   : > { %857 = vst [vmem:[%s1530_s8 + $0x118] sm:$0xff] %v679_v13  ;;  %824 = vst [vmem:[%s1530_s8 + $0x10] sm:$0xff] %v514_v16  ;;  %v1115_v18 = vpop.f32.mrb[4].mxu0 }
  0xf6   : > { %856 = vst [vmem:[%s1530_s8 + $0x110] sm:$0xff] %v674_v17  ;;  %v1163_v19 = vpop.f32.mrb[4].mxu1  ;;  %v529_v20 = vadd.f32 %v1115_v18, %v1524_v1  ;;  %v523_v22 = vpop.f32.mrb[5].mxu0 }
  0xf7   : > { %v689_v21 = vadd.f32 %v1163_v19, %v1524_v1  ;;  %v683_v23 = vpop.f32.mrb[5].mxu1  ;;  %v524_v24 = vadd.f32 %v1524_v1, %v523_v22 }
  0xf8   : > { %v684_v25 = vadd.f32 %v1524_v1, %v683_v23  ;;  %827 = vst [vmem:[%s1530_s8 + $0x28] sm:$0xff] %v529_v20 }
  0xf9   : > { %859 = vst [vmem:[%s1530_s8 + $0x128] sm:$0xff] %v689_v21  ;;  %826 = vst [vmem:[%s1530_s8 + $0x20] sm:$0xff] %v524_v24  ;;  %v1118_v26 = vpop.f32.mrb[6].mxu0 }
  0xfa   : > { %858 = vst [vmem:[%s1530_s8 + $0x120] sm:$0xff] %v684_v25  ;;  %v1166_v27 = vpop.f32.mrb[6].mxu1  ;;  %v539_v28 = vadd.f32 %v1118_v26, %v1524_v1  ;;  %v533_v30 = vpop.f32.mrb[7].mxu0 }
  0xfb   : > { %v699_v29 = vadd.f32 %v1166_v27, %v1524_v1  ;;  %v693_v31 = vpop.f32.mrb[7].mxu1  ;;  %v534_v32 = vadd.f32 %v1524_v1, %v533_v30 }
  0xfc   : > { %v694_v33 = vadd.f32 %v1524_v1, %v693_v31  ;;  %829 = vst [vmem:[%s1530_s8 + $0x38] sm:$0xff] %v539_v28 }
  0xfd   : > { %861 = vst [vmem:[%s1530_s8 + $0x138] sm:$0xff] %v699_v29  ;;  %828 = vst [vmem:[%s1530_s8 + $0x30] sm:$0xff] %v534_v32  ;;  %v1121_v34 = vpop.f32.mrb[8].mxu0 }
  0xfe   : > { %860 = vst [vmem:[%s1530_s8 + $0x130] sm:$0xff] %v694_v33  ;;  %v1169_v35 = vpop.f32.mrb[8].mxu1  ;;  %v549_v36 = vadd.f32 %v1121_v34, %v1524_v1  ;;  %v543_v38 = vpop.f32.mrb[9].mxu0 }
  0xff   : > { %v709_v37 = vadd.f32 %v1169_v35, %v1524_v1  ;;  %v703_v39 = vpop.f32.mrb[9].mxu1  ;;  %v544_v40 = vadd.f32 %v1524_v1, %v543_v38 }
 0x100   : > { %v704_v41 = vadd.f32 %v1524_v1, %v703_v39  ;;  %831 = vst [vmem:[%s1530_s8 + $0x48] sm:$0xff] %v549_v36 }
 0x101   : > { %863 = vst [vmem:[%s1530_s8 + $0x148] sm:$0xff] %v709_v37  ;;  %830 = vst [vmem:[%s1530_s8 + $0x40] sm:$0xff] %v544_v40  ;;  %v1124_v42 = vpop.f32.mrb[10].mxu0 }
 0x102   : > { %862 = vst [vmem:[%s1530_s8 + $0x140] sm:$0xff] %v704_v41  ;;  %v1172_v43 = vpop.f32.mrb[10].mxu1  ;;  %v559_v44 = vadd.f32 %v1124_v42, %v1524_v1  ;;  %v553_v46 = vpop.f32.mrb[11].mxu0 }
 0x103   : > { %v719_v45 = vadd.f32 %v1172_v43, %v1524_v1  ;;  %v713_v47 = vpop.f32.mrb[11].mxu1  ;;  %v554_v48 = vadd.f32 %v1524_v1, %v553_v46 }
 0x104   : > { %v714_v49 = vadd.f32 %v1524_v1, %v713_v47  ;;  %833 = vst [vmem:[%s1530_s8 + $0x58] sm:$0xff] %v559_v44 }
 0x105   : > { %865 = vst [vmem:[%s1530_s8 + $0x158] sm:$0xff] %v719_v45  ;;  %832 = vst [vmem:[%s1530_s8 + $0x50] sm:$0xff] %v554_v48  ;;  %v1127_v50 = vpop.f32.mrb[12].mxu0 }
 0x106   : > { %864 = vst [vmem:[%s1530_s8 + $0x150] sm:$0xff] %v714_v49  ;;  %v1175_v51 = vpop.f32.mrb[12].mxu1  ;;  %v569_v52 = vadd.f32 %v1127_v50, %v1524_v1  ;;  %v563_v54 = vpop.f32.mrb[13].mxu0 }
 0x107   : > { %v729_v53 = vadd.f32 %v1175_v51, %v1524_v1  ;;  %v723_v55 = vpop.f32.mrb[13].mxu1  ;;  %v564_v56 = vadd.f32 %v1524_v1, %v563_v54 }
 0x108   : > { %v724_v57 = vadd.f32 %v1524_v1, %v723_v55  ;;  %835 = vst [vmem:[%s1530_s8 + $0x68] sm:$0xff] %v569_v52 }
 0x109   : > { %867 = vst [vmem:[%s1530_s8 + $0x168] sm:$0xff] %v729_v53  ;;  %834 = vst [vmem:[%s1530_s8 + $0x60] sm:$0xff] %v564_v56  ;;  %v1130_v58 = vpop.f32.mrb[14].mxu0 }
 0x10a   : > { %866 = vst [vmem:[%s1530_s8 + $0x160] sm:$0xff] %v724_v57  ;;  %v1178_v59 = vpop.f32.mrb[14].mxu1  ;;  %v579_v60 = vadd.f32 %v1130_v58, %v1524_v1  ;;  %v573_v62 = vpop.f32.mrb[15].mxu0 }
 0x10b   : > { %v739_v61 = vadd.f32 %v1178_v59, %v1524_v1  ;;  %v733_v63 = vpop.f32.mrb[15].mxu1  ;;  %v574_v0 = vadd.f32 %v1524_v1, %v573_v62 }
 0x10c   : > { %v734_v2 = vadd.f32 %v1524_v1, %v733_v63  ;;  %837 = vst [vmem:[%s1530_s8 + $0x78] sm:$0xff] %v579_v60 }
 0x10d   : > { %869 = vst [vmem:[%s1530_s8 + $0x178] sm:$0xff] %v739_v61  ;;  %836 = vst [vmem:[%s1530_s8 + $0x70] sm:$0xff] %v574_v0  ;;  %v1133_v3 = vpop.f32.mrb[16].mxu0 }
 0x10e   : > { %868 = vst [vmem:[%s1530_s8 + $0x170] sm:$0xff] %v734_v2  ;;  %v1181_v4 = vpop.f32.mrb[16].mxu1  ;;  %v589_v5 = vadd.f32 %v1133_v3, %v1524_v1  ;;  %v583_v7 = vpop.f32.mrb[17].mxu0 }
 0x10f   : > { %v749_v6 = vadd.f32 %v1181_v4, %v1524_v1  ;;  %v743_v8 = vpop.f32.mrb[17].mxu1  ;;  %v584_v9 = vadd.f32 %v1524_v1, %v583_v7 }
 0x110   : > { %v744_v10 = vadd.f32 %v1524_v1, %v743_v8  ;;  %839 = vst [vmem:[%s1530_s8 + $0x88] sm:$0xff] %v589_v5 }
 0x111   : > { %871 = vst [vmem:[%s1530_s8 + $0x188] sm:$0xff] %v749_v6  ;;  %838 = vst [vmem:[%s1530_s8 + $0x80] sm:$0xff] %v584_v9  ;;  %v1136_v11 = vpop.f32.mrb[18].mxu0 }
 0x112   : > { %870 = vst [vmem:[%s1530_s8 + $0x180] sm:$0xff] %v744_v10  ;;  %v1184_v12 = vpop.f32.mrb[18].mxu1  ;;  %v599_v13 = vadd.f32 %v1136_v11, %v1524_v1  ;;  %v593_v15 = vpop.f32.mrb[19].mxu0 }
 0x113   : > { %v759_v14 = vadd.f32 %v1184_v12, %v1524_v1  ;;  %v753_v16 = vpop.f32.mrb[19].mxu1  ;;  %v594_v17 = vadd.f32 %v1524_v1, %v593_v15 }
 0x114   : > { %v754_v18 = vadd.f32 %v1524_v1, %v753_v16  ;;  %841 = vst [vmem:[%s1530_s8 + $0x98] sm:$0xff] %v599_v13 }
 0x115   : > { %873 = vst [vmem:[%s1530_s8 + $0x198] sm:$0xff] %v759_v14  ;;  %840 = vst [vmem:[%s1530_s8 + $0x90] sm:$0xff] %v594_v17  ;;  %v1139_v19 = vpop.f32.mrb[20].mxu0 }
 0x116   : > { %872 = vst [vmem:[%s1530_s8 + $0x190] sm:$0xff] %v754_v18  ;;  %v1187_v20 = vpop.f32.mrb[20].mxu1  ;;  %v609_v21 = vadd.f32 %v1139_v19, %v1524_v1  ;;  %v603_v23 = vpop.f32.mrb[21].mxu0 }
 0x117   : > { %v769_v22 = vadd.f32 %v1187_v20, %v1524_v1  ;;  %v763_v24 = vpop.f32.mrb[21].mxu1  ;;  %v604_v25 = vadd.f32 %v1524_v1, %v603_v23 }
 0x118   : > { %v764_v26 = vadd.f32 %v1524_v1, %v763_v24  ;;  %843 = vst [vmem:[%s1530_s8 + $0xa8] sm:$0xff] %v609_v21 }
 0x119   : > { %875 = vst [vmem:[%s1530_s8 + $0x1a8] sm:$0xff] %v769_v22  ;;  %842 = vst [vmem:[%s1530_s8 + $0xa0] sm:$0xff] %v604_v25  ;;  %v1142_v27 = vpop.f32.mrb[22].mxu0 }
 0x11a   : > { %874 = vst [vmem:[%s1530_s8 + $0x1a0] sm:$0xff] %v764_v26  ;;  %v1190_v28 = vpop.f32.mrb[22].mxu1  ;;  %v619_v29 = vadd.f32 %v1142_v27, %v1524_v1  ;;  %v613_v31 = vpop.f32.mrb[23].mxu0 }
 0x11b   : > { %v779_v30 = vadd.f32 %v1190_v28, %v1524_v1  ;;  %v773_v32 = vpop.f32.mrb[23].mxu1  ;;  %v614_v33 = vadd.f32 %v1524_v1, %v613_v31 }
 0x11c   : > { %v774_v34 = vadd.f32 %v1524_v1, %v773_v32  ;;  %845 = vst [vmem:[%s1530_s8 + $0xb8] sm:$0xff] %v619_v29 }
 0x11d   : > { %877 = vst [vmem:[%s1530_s8 + $0x1b8] sm:$0xff] %v779_v30  ;;  %844 = vst [vmem:[%s1530_s8 + $0xb0] sm:$0xff] %v614_v33  ;;  %v1145_v35 = vpop.f32.mrb[24].mxu0 }
 0x11e   : > { %876 = vst [vmem:[%s1530_s8 + $0x1b0] sm:$0xff] %v774_v34  ;;  %v1193_v36 = vpop.f32.mrb[24].mxu1  ;;  %v629_v37 = vadd.f32 %v1145_v35, %v1524_v1  ;;  %v623_v39 = vpop.f32.mrb[25].mxu0 }
 0x11f   : > { %v789_v38 = vadd.f32 %v1193_v36, %v1524_v1  ;;  %v783_v40 = vpop.f32.mrb[25].mxu1  ;;  %v624_v41 = vadd.f32 %v1524_v1, %v623_v39 }
 0x120   : > { %v784_v42 = vadd.f32 %v1524_v1, %v783_v40  ;;  %847 = vst [vmem:[%s1530_s8 + $0xc8] sm:$0xff] %v629_v37 }
 0x121   : > { %879 = vst [vmem:[%s1530_s8 + $0x1c8] sm:$0xff] %v789_v38  ;;  %846 = vst [vmem:[%s1530_s8 + $0xc0] sm:$0xff] %v624_v41  ;;  %v1148_v43 = vpop.f32.mrb[26].mxu0 }
 0x122   : > { %878 = vst [vmem:[%s1530_s8 + $0x1c0] sm:$0xff] %v784_v42  ;;  %v1196_v44 = vpop.f32.mrb[26].mxu1  ;;  %v639_v45 = vadd.f32 %v1148_v43, %v1524_v1  ;;  %v633_v47 = vpop.f32.mrb[27].mxu0 }
 0x123   : > { %v799_v46 = vadd.f32 %v1196_v44, %v1524_v1  ;;  %v793_v48 = vpop.f32.mrb[27].mxu1  ;;  %v634_v49 = vadd.f32 %v1524_v1, %v633_v47 }
 0x124   : > { %v794_v50 = vadd.f32 %v1524_v1, %v793_v48  ;;  %849 = vst [vmem:[%s1530_s8 + $0xd8] sm:$0xff] %v639_v45 }
 0x125   : > { %881 = vst [vmem:[%s1530_s8 + $0x1d8] sm:$0xff] %v799_v46  ;;  %848 = vst [vmem:[%s1530_s8 + $0xd0] sm:$0xff] %v634_v49  ;;  %v1151_v51 = vpop.f32.mrb[28].mxu0 }
 0x126   : > { %880 = vst [vmem:[%s1530_s8 + $0x1d0] sm:$0xff] %v794_v50  ;;  %v1199_v52 = vpop.f32.mrb[28].mxu1  ;;  %v649_v53 = vadd.f32 %v1151_v51, %v1524_v1  ;;  %v643_v55 = vpop.f32.mrb[29].mxu0 }
 0x127   : > { %v809_v54 = vadd.f32 %v1199_v52, %v1524_v1  ;;  %v803_v56 = vpop.f32.mrb[29].mxu1  ;;  %v644_v57 = vadd.f32 %v1524_v1, %v643_v55 }
 0x128   : > { %v804_v58 = vadd.f32 %v1524_v1, %v803_v56  ;;  %851 = vst [vmem:[%s1530_s8 + $0xe8] sm:$0xff] %v649_v53 }
 0x129   : > { %883 = vst [vmem:[%s1530_s8 + $0x1e8] sm:$0xff] %v809_v54  ;;  %850 = vst [vmem:[%s1530_s8 + $0xe0] sm:$0xff] %v644_v57  ;;  %v1154_v59 = vpop.f32.mrb[30].mxu0 }
 0x12a   : > { %882 = vst [vmem:[%s1530_s8 + $0x1e0] sm:$0xff] %v804_v58  ;;  %v1202_v60 = vpop.f32.mrb[30].mxu1  ;;  %v659_v61 = vadd.f32 %v1154_v59, %v1524_v1  ;;  %v653_v63 = vpop.f32.mrb[31].mxu0 }
 0x12b   : > { %v819_v62 = vadd.f32 %v1202_v60, %v1524_v1  ;;  %v813_v0 = vpop.f32.mrb[31].mxu1  ;;  %v654_v2 = vadd.f32 %v1524_v1, %v653_v63 }
 0x12c   : > { %v814_v3 = vadd.f32 %v1524_v1, %v813_v0  ;;  %853 = vst [vmem:[%s1530_s8 + $0xf8] sm:$0xff] %v659_v61 }
 0x12d   : > { %885 = vst [vmem:[%s1530_s8 + $0x1f8] sm:$0xff] %v819_v62  ;;  %852 = vst [vmem:[%s1530_s8 + $0xf0] sm:$0xff] %v654_v2 }
 0x12e   : > { %884 = vst [vmem:[%s1530_s8 + $0x1f0] sm:$0xff] %v814_v3 }
 0x12f   : > { %1259 = shalt.err (!%p1256_p3)
}
 0x130   : > { %s1260_s27 = scalar_lea.hbm %s1655_s17, 8192  ;;  %s1264_s30 = scalar_lea.hbm %s1711_s3, 32768 }
 0x131   : > { %p1261_p4 = scmp.ne.s32.totalorder %s1655_s17, %s1260_s27  ;;  %p1265_p9 = scmp.lt.u32.totalorder %s1655_s17, %s1711_s3 }
 0x132   : > { %p1266_p10 = scmp.lt.u32.totalorder %s1264_s30, %s1260_s27  ;;  %p1268_p12 = scmp.lt.u32.totalorder %s1260_s27, %s1655_s17 }
 0x133   : > { %p1262_p7 = pnand %p1261_p4, %p1371_p5 }
 0x134   : > { %p1267_p11 = por %p1266_p10, %p1265_p9 }
 0x135   : > { %p1263_p8 = pneg %p1262_p7 }
 0x136   : > { %p1269_p13 = por %p1268_p12, %p1267_p11 }
 0x138   : > { %p1270_p0 = pnand %p1269_p13, %p1263_p8 }
 0x13a   : > { %1273 = shalt.err (!%p1270_p0)
}
 0x13b   : > { %s1311_s6 = smov 128   ;;  %s1312_s7 = smov 8  }
 0x13c   : > { %1205 = dma.vmem_to_hbm [thread:$0]  (%p1371_p5), %s1657_s10, 8192, %s1655_s17, %s1667_s19, %s1311_s6, %s1311_s6, %s1312_s7  }
 0x13d PF: > { %p1211_p1 = scmp.ge.s32.totalorder %s1308_s15, 2  ;;  %s915_s8 = sand.u32 1, %s1296_s12  }
 0x13e   : > { %s916_s9 = scalar_lea.sflag [#allocation3], %s915_s8 }
 0x13f   : > { %p1208_p2 = pnand %p1211_p1, %p1375_p6 }
 0x141   : > { %1291 = dma.done.wait (!%p1208_p2), %s916_s9, 8192  }
 0x142   : > { %1293 = vsyncadd (!%p1208_p2), %s916_s9, 4294959104  ;;  %p13_p3 = scmp.ge.s32.totalorder %s1358_s18, 6   ;;  %s1714_s12 = smov %s1300_s13 }
 0x143   : > { %s1715_s13 = smov %s1304_s14  ;;  %s1716_s14 = smov %s1369_s21 }
 0x144   : > { %s1717_s15 = smov %s1358_s18  ;;  %15 = sbr.rel (!%p13_p3) target bundleno = 3 (0x3), region = 67 }
 0x14b   :  { %921 = vsyncpa [#allocation3], 1 }
 0x14c   :  { %923 = vsyncpa [#allocation3 + $0x1], 1 }

</bundles_post_ra>
